<compile_context>
chip_gen: v5e
topology: v5e:2x2
jax: 0.10.0
libtpu: 0.0.40
codegen_flags: <defaults>
</compile_context>

<pallas_src>
import jax
import jax.numpy as jnp
from jax.experimental import pallas as pl
from jax.experimental.pallas import tpu as pltpu


def powernet_kernel(x_ref,
                    w1_ref, b1_ref,
                    w2_ref, b2_ref,
                    w3_ref, b3_ref,
                    w4_ref, b4_ref,
                    o_ref):
    """Fused (Linear+ReLU) x3 -> Linear(wide) for one batch tile.

    x_ref : (TB, 103) activation tile (f32 or bf16, streamed as-is from HBM)
    wN    : (in, out) weights in matmul-operand dtype; w4 stored transposed (1, 36)
    bN    : (1, out) float32 biases; b4 stored as (1, 1)
    o_ref : (1, 1, TB) lane-dense output row for this tile
    """
    cdt = w1_ref.dtype  # matmul operand dtype (bf16 fast path or f32 exact path)

    x = x_ref[...].astype(cdt)

    # fc1 + ReLU (MXU accumulates f32; bias/ReLU on the VPU in f32)
    h = jnp.dot(x, w1_ref[...], preferred_element_type=jnp.float32) + b1_ref[...]
    h = jnp.maximum(h, 0.0)

    # fc2 + ReLU
    h = jnp.dot(h.astype(cdt), w2_ref[...], preferred_element_type=jnp.float32) + b2_ref[...]
    h = jnp.maximum(h, 0.0)

    # fc3 + ReLU
    h = jnp.dot(h.astype(cdt), w3_ref[...], preferred_element_type=jnp.float32) + b3_ref[...]
    h = jnp.maximum(h, 0.0)

    # fc4 (wide, 36 -> 1), computed lane-dense: (1,36) contracted with (TB,36)
    # along the feature axis -> (1, TB).  The store is a full-lane row instead
    # of a 1-wide column of masked partial stores.
    out_row = jax.lax.dot_general(
        w4_ref[...], h.astype(cdt),
        dimension_numbers=(((1,), (1,)), ((), ())),
        preferred_element_type=jnp.float32) + b4_ref[...]

    o_ref[...] = out_row.reshape(o_ref.shape).astype(o_ref.dtype)


def _round_up(n, m):
    return ((n + m - 1) // m) * m


def _pick_tile(B, block_batch, sublane):
    """Batch tile size: sublane-aligned always; 128-aligned and >=2 tiles when B is large."""
    tb = max(min(block_batch, B), sublane)
    tb = _round_up(tb, sublane)
    if B > 128:
        # Cap so there are at least 2 tiles (v7x megacore actually splits the
        # "parallel" axis), and keep the (1,1,tb) output store full-lane.
        tb = min(tb, _round_up(-(-B // 2), 128))
        tb = _round_up(tb, 128)
    return tb


def powernet_forward(x, params, *, block_batch=2048, compute_dtype=jnp.bfloat16):
    """PowerNet forward. x: (B, 103) float32/bfloat16. Returns (B, 1) float32.

    Pass x already in bfloat16 (fp8 on v7x, if quantization tolerance allows) to
    halve the activation DMA stream -- the kernel casts to `compute_dtype` in
    registers, so no wrapper-side astype / extra HBM round trip is inserted here.
    """
    (w1, b1), (w2, b2), (w3, b3), (w4, b4) = params
    B, F = x.shape
    assert F == 103, F

    # Weights in matmul-operand dtype (cast once, tiny); biases in f32.
    cast = lambda w: w.astype(compute_dtype)
    w1c, w2c, w3c = cast(w1), cast(w2), cast(w3)
    w4r = cast(w4).reshape(1, 36)                    # last layer stored transposed
    b1f, b2f, b3f = (b.astype(jnp.float32) for b in (b1, b2, b3))
    b4r = b4.reshape(1, 1).astype(jnp.float32)

    x_itemsize = jnp.dtype(x.dtype).itemsize
    sublane = 16 if x_itemsize == 2 else 8           # bf16 packs 2 rows per sublane

    tb = _pick_tile(B, block_batch, sublane)
    b_pad = _round_up(B, tb)
    if b_pad != B:
        x = jnp.pad(x, ((0, b_pad - B), (0, 0)))     # pad rows sliced off below
    num_tiles = b_pad // tb

    # Weights/biases: full-array block + constant index_map => VMEM-resident
    # across grid steps (no re-DMA).
    resident = lambda a: pl.BlockSpec(a.shape, lambda i, _nd=a.ndim: (0,) * _nd)

    # Advisory cost hint so XLA overlaps neighbouring ops around this short call.
    w_itemsize = jnp.dtype(compute_dtype).itemsize
    flops_per_row = 2 * (103 * 64 + 64 * 144 + 144 * 36 + 36 * 1)
    weight_bytes = (103 * 64 + 64 * 144 + 144 * 36 + 36) * w_itemsize + (64 + 144 + 36 + 1) * 4
    cost = pl.CostEstimate(
        flops=flops_per_row * b_pad,
        transcendentals=0,
        bytes_accessed=b_pad * (103 * x_itemsize + 4) + weight_bytes,
    )

    # Rough per-tile VMEM working set (lane-padded); only override the scoped
    # limit when it would exceed the v5e 16 MiB default.
    lanes = lambda n: _round_up(n, 128)
    vmem_est = (
        2 * tb * lanes(103) * x_itemsize                     # x double buffer
        + tb * lanes(103) * w_itemsize                       # in-register cast copy
        + tb * (lanes(64) + lanes(144) + lanes(36)) * (4 + w_itemsize)  # f32 h + casts
        + 2 * tb * 4                                         # output double buffer
        + (1 << 20)                                          # weights + slack
    )
    compiler_kwargs = {}
    if vmem_est > (14 << 20):
        compiler_kwargs["vmem_limit_bytes"] = min(vmem_est + (8 << 20), 48 << 20)

    out = pl.pallas_call(
        powernet_kernel,
        out_shape=jax.ShapeDtypeStruct((num_tiles, 1, tb), jnp.float32),
        grid=(num_tiles,),
        in_specs=[
            pl.BlockSpec((tb, 103), lambda i: (i, 0)),       # streamed activation tile
            resident(w1c), resident(b1f),
            resident(w2c), resident(b2f),
            resident(w3c), resident(b3f),
            resident(w4r), resident(b4r),
        ],
        out_specs=pl.BlockSpec((1, 1, tb), lambda i: (i, 0, 0)),
        compiler_params=pltpu.CompilerParams(
            dimension_semantics=("parallel",), **compiler_kwargs),
        cost_estimate=cost,
    )(x, w1c, b1f, w2c, b2f, w3c, b3f, w4r, b4r)

    # (num_tiles, 1, TB) lane-dense rows -> (B, 1) column, dropping batch pad.
    return out.reshape(-1)[:B].reshape(B, 1)


def init_params(key):
    """Deterministic params. Weights (in_features, out_features), biases (1, out)."""
    dims = [(103, 64), (64, 144), (144, 36), (36, 1)]
    params = []
    for d_in, d_out in dims:
        kw, kb, key = jax.random.split(key, 3)
        bound = 1.0 / (d_in ** 0.5)   # torch.nn.Linear default-ish init
        w = jax.random.uniform(kw, (d_in, d_out), jnp.float32, -bound, bound)
        b = jax.random.uniform(kb, (1, d_out), jnp.float32, -bound, bound)
        params.append((w, b))
    return params


def reference_forward(x, params):
    """Pure-JAX f32 reference."""
    (w1, b1), (w2, b2), (w3, b3), (w4, b4) = params
    h = jnp.maximum(x @ w1 + b1, 0.0)
    h = jnp.maximum(h @ w2 + b2, 0.0)
    h = jnp.maximum(h @ w3 + b3, 0.0)
    return h @ w4 + b4


if __name__ == "__main__":
    key = jax.random.PRNGKey(0)
    kx, kx2, kp = jax.random.split(key, 3)

    params = init_params(kp)

    # Small batch, same as the original demo.
    x_small = jax.random.normal(kx, (8, 103), dtype=jnp.float32)
    ref_small = reference_forward(x_small, params)

    # Exact-semantics path (f32 activations + f32 matmul operands).
    out_f32 = jax.block_until_ready(
        powernet_forward(x_small, params, compute_dtype=jnp.float32))
    assert out_f32.shape == (8, 1), out_f32.shape
    assert jnp.allclose(out_f32, ref_small, atol=1e-4, rtol=1e-4), "f32 kernel mismatch"

    # Fast path: bf16 activations streamed from HBM + bf16 matmul operands
    # (f32 accumulation) -- bf16-level tolerance.
    out_bf16 = jax.block_until_ready(
        powernet_forward(x_small.astype(jnp.bfloat16), params,
                         compute_dtype=jnp.bfloat16))
    assert out_bf16.shape == (8, 1), out_bf16.shape
    assert jnp.allclose(out_bf16, ref_small, atol=3e-2, rtol=3e-2), "bf16 kernel mismatch"

    # Larger non-divisible batch exercises multi-tile grid (>=2 tiles, 128-aligned
    # tb), padding, and the slicing path; also exercises a "bad" block_batch.
    x_big = jax.random.normal(kx2, (300, 103), dtype=jnp.float32)
    ref_big = reference_forward(x_big, params)
    out_big = jax.block_until_ready(
        powernet_forward(x_big, params, block_batch=100, compute_dtype=jnp.float32))
    assert out_big.shape == (300, 1), out_big.shape
    assert jnp.allclose(out_big, ref_big, atol=1e-4, rtol=1e-4), "tiled kernel mismatch"

    # bf16 streaming over the multi-tile path as well.
    out_big_bf16 = jax.block_until_ready(
        powernet_forward(x_big.astype(jnp.bfloat16), params,
                         block_batch=2048, compute_dtype=jnp.bfloat16))
    assert out_big_bf16.shape == (300, 1), out_big_bf16.shape
    assert jnp.allclose(out_big_bf16, ref_big, atol=3e-2, rtol=3e-2), "bf16 tiled mismatch"

    print("KERNEL_OK")
</pallas_src>

<mosaic_0001>
module attributes {stable_mosaic.version = 11 : i64} {
  func.func @powernet_kernel(%arg0: i32, %arg1: memref<8x103xf32, #tpu.memory_space<vmem>>, %arg2: memref<103x64xf32, #tpu.memory_space<vmem>>, %arg3: memref<1x64xf32, #tpu.memory_space<vmem>>, %arg4: memref<64x144xf32, #tpu.memory_space<vmem>>, %arg5: memref<1x144xf32, #tpu.memory_space<vmem>>, %arg6: memref<144x36xf32, #tpu.memory_space<vmem>>, %arg7: memref<1x36xf32, #tpu.memory_space<vmem>>, %arg8: memref<1x36xf32, #tpu.memory_space<vmem>>, %arg9: memref<1x1xf32, #tpu.memory_space<vmem>>, %arg10: memref<1x1x8xf32, #tpu.memory_space<vmem>>) attributes {dimension_semantics = [#tpu.dimension_semantics<parallel>], iteration_bounds = array<i64: 1>, scalar_prefetch = 0 : i64, scratch_operands = 0 : i64, tpu.core_type = #tpu.core_type<tc>, window_params = [{transform_indices = @transform_0, window_bounds = array<i64: 8, 103>}, {pipeline_mode = #tpu.pipeline_mode<synchronous>, transform_indices = @transform_1, window_bounds = array<i64: 103, 64>}, {pipeline_mode = #tpu.pipeline_mode<synchronous>, transform_indices = @transform_2, window_bounds = array<i64: 1, 64>}, {pipeline_mode = #tpu.pipeline_mode<synchronous>, transform_indices = @transform_3, window_bounds = array<i64: 64, 144>}, {pipeline_mode = #tpu.pipeline_mode<synchronous>, transform_indices = @transform_4, window_bounds = array<i64: 1, 144>}, {pipeline_mode = #tpu.pipeline_mode<synchronous>, transform_indices = @transform_5, window_bounds = array<i64: 144, 36>}, {pipeline_mode = #tpu.pipeline_mode<synchronous>, transform_indices = @transform_6, window_bounds = array<i64: 1, 36>}, {pipeline_mode = #tpu.pipeline_mode<synchronous>, transform_indices = @transform_7, window_bounds = array<i64: 1, 36>}, {pipeline_mode = #tpu.pipeline_mode<synchronous>, transform_indices = @transform_8, window_bounds = array<i64: 1, 1>}, {transform_indices = @transform_9, window_bounds = array<i64: 1, 1, 8>}]} {
    %c0 = arith.constant 0 : index
    %c0_0 = arith.constant 0 : index
    %0 = vector.load %arg1[%c0, %c0_0] : memref<8x103xf32, #tpu.memory_space<vmem>>, vector<8x103xf32>
    %c0_1 = arith.constant 0 : index
    %c0_2 = arith.constant 0 : index
    %1 = vector.load %arg2[%c0_1, %c0_2] : memref<103x64xf32, #tpu.memory_space<vmem>>, vector<103x64xf32>
    %cst = arith.constant dense<0.000000e+00> : vector<8x64xf32>
    %2 = tpu.matmul %0, %1, %cst {dimension_numbers = #tpu.dot_dimension_numbers<[1], [0], [0], [1], [0, 0, 1, 1], [], []>} : vector<8x103xf32>, vector<103x64xf32>, vector<8x64xf32> -> vector<8x64xf32>
    %c0_3 = arith.constant 0 : index
    %c0_4 = arith.constant 0 : index
    %3 = vector.load %arg3[%c0_3, %c0_4] : memref<1x64xf32, #tpu.memory_space<vmem>>, vector<1x64xf32>
    %4 = vector.broadcast %3 : vector<1x64xf32> to vector<8x64xf32>
    %5 = arith.addf %2, %4 : vector<8x64xf32>
    %cst_5 = arith.constant 0.000000e+00 : f32
    %6 = vector.broadcast %cst_5 : f32 to vector<8x64xf32>
    %7 = arith.maximumf %5, %6 : vector<8x64xf32>
    %c0_6 = arith.constant 0 : index
    %c0_7 = arith.constant 0 : index
    %8 = vector.load %arg4[%c0_6, %c0_7] : memref<64x144xf32, #tpu.memory_space<vmem>>, vector<64x144xf32>
    %cst_8 = arith.constant dense<0.000000e+00> : vector<8x144xf32>
    %9 = tpu.matmul %7, %8, %cst_8 {dimension_numbers = #tpu.dot_dimension_numbers<[1], [0], [0], [1], [0, 0, 1, 1], [], []>} : vector<8x64xf32>, vector<64x144xf32>, vector<8x144xf32> -> vector<8x144xf32>
    %c0_9 = arith.constant 0 : index
    %c0_10 = arith.constant 0 : index
    %10 = vector.load %arg5[%c0_9, %c0_10] : memref<1x144xf32, #tpu.memory_space<vmem>>, vector<1x144xf32>
    %11 = vector.broadcast %10 : vector<1x144xf32> to vector<8x144xf32>
    %12 = arith.addf %9, %11 : vector<8x144xf32>
    %cst_11 = arith.constant 0.000000e+00 : f32
    %13 = vector.broadcast %cst_11 : f32 to vector<8x144xf32>
    %14 = arith.maximumf %12, %13 : vector<8x144xf32>
    %c0_12 = arith.constant 0 : index
    %c0_13 = arith.constant 0 : index
    %15 = vector.load %arg6[%c0_12, %c0_13] : memref<144x36xf32, #tpu.memory_space<vmem>>, vector<144x36xf32>
    %cst_14 = arith.constant dense<0.000000e+00> : vector<8x36xf32>
    %16 = tpu.matmul %14, %15, %cst_14 {dimension_numbers = #tpu.dot_dimension_numbers<[1], [0], [0], [1], [0, 0, 1, 1], [], []>} : vector<8x144xf32>, vector<144x36xf32>, vector<8x36xf32> -> vector<8x36xf32>
    %c0_15 = arith.constant 0 : index
    %c0_16 = arith.constant 0 : index
    %17 = vector.load %arg7[%c0_15, %c0_16] : memref<1x36xf32, #tpu.memory_space<vmem>>, vector<1x36xf32>
    %18 = vector.broadcast %17 : vector<1x36xf32> to vector<8x36xf32>
    %19 = arith.addf %16, %18 : vector<8x36xf32>
    %cst_17 = arith.constant 0.000000e+00 : f32
    %20 = vector.broadcast %cst_17 : f32 to vector<8x36xf32>
    %21 = arith.maximumf %19, %20 : vector<8x36xf32>
    %c0_18 = arith.constant 0 : index
    %c0_19 = arith.constant 0 : index
    %22 = vector.load %arg8[%c0_18, %c0_19] : memref<1x36xf32, #tpu.memory_space<vmem>>, vector<1x36xf32>
    %cst_20 = arith.constant dense<0.000000e+00> : vector<1x8xf32>
    %23 = tpu.matmul %22, %21, %cst_20 {dimension_numbers = #tpu.dot_dimension_numbers<[1], [1], [0], [0], [0, 0, 1, 0], [], []>} : vector<1x36xf32>, vector<8x36xf32>, vector<1x8xf32> -> vector<1x8xf32>
    %c0_21 = arith.constant 0 : index
    %c0_22 = arith.constant 0 : index
    %24 = vector.load %arg9[%c0_21, %c0_22] : memref<1x1xf32, #tpu.memory_space<vmem>>, vector<1x1xf32>
    %25 = vector.broadcast %24 : vector<1x1xf32> to vector<1x8xf32>
    %26 = arith.addf %23, %25 : vector<1x8xf32>
    %27 = vector.shape_cast %26 : vector<1x8xf32> to vector<1x1x8xf32>
    %c0_23 = arith.constant 0 : index
    %c0_24 = arith.constant 0 : index
    %c0_25 = arith.constant 0 : index
    %28 = vector.load %arg10[%c0_23, %c0_24, %c0_25] : memref<1x1x8xf32, #tpu.memory_space<vmem>>, vector<1x1x8xf32>
    tpu.vector_store %arg10[%c0_23, %c0_24, %c0_25], %27 {strides = array<i32>} : memref<1x1x8xf32, #tpu.memory_space<vmem>>, vector<1x1x8xf32>,
    return
  }
  func.func @transform_0(%arg0: i32) -> (i32, i32) {
    %c0_i32 = arith.constant 0 : i32
    %c0_i32_0 = arith.constant 0 : i32
    return %arg0, %c0_i32 : i32, i32
  }
  func.func @transform_1(%arg0: i32) -> (i32, i32) {
    %c0_i32 = arith.constant 0 : i32
    %c0_i32_0 = arith.constant 0 : i32
    %c0_i32_1 = arith.constant 0 : i32
    return %c0_i32, %c0_i32_0 : i32, i32
  }
  func.func @transform_2(%arg0: i32) -> (i32, i32) {
    %c0_i32 = arith.constant 0 : i32
    %c0_i32_0 = arith.constant 0 : i32
    %c0_i32_1 = arith.constant 0 : i32
    return %c0_i32, %c0_i32_0 : i32, i32
  }
  func.func @transform_3(%arg0: i32) -> (i32, i32) {
    %c0_i32 = arith.constant 0 : i32
    %c0_i32_0 = arith.constant 0 : i32
    %c0_i32_1 = arith.constant 0 : i32
    return %c0_i32, %c0_i32_0 : i32, i32
  }
  func.func @transform_4(%arg0: i32) -> (i32, i32) {
    %c0_i32 = arith.constant 0 : i32
    %c0_i32_0 = arith.constant 0 : i32
    %c0_i32_1 = arith.constant 0 : i32
    return %c0_i32, %c0_i32_0 : i32, i32
  }
  func.func @transform_5(%arg0: i32) -> (i32, i32) {
    %c0_i32 = arith.constant 0 : i32
    %c0_i32_0 = arith.constant 0 : i32
    %c0_i32_1 = arith.constant 0 : i32
    return %c0_i32, %c0_i32_0 : i32, i32
  }
  func.func @transform_6(%arg0: i32) -> (i32, i32) {
    %c0_i32 = arith.constant 0 : i32
    %c0_i32_0 = arith.constant 0 : i32
    %c0_i32_1 = arith.constant 0 : i32
    return %c0_i32, %c0_i32_0 : i32, i32
  }
  func.func @transform_7(%arg0: i32) -> (i32, i32) {
    %c0_i32 = arith.constant 0 : i32
    %c0_i32_0 = arith.constant 0 : i32
    %c0_i32_1 = arith.constant 0 : i32
    return %c0_i32, %c0_i32_0 : i32, i32
  }
  func.func @transform_8(%arg0: i32) -> (i32, i32) {
    %c0_i32 = arith.constant 0 : i32
    %c0_i32_0 = arith.constant 0 : i32
    %c0_i32_1 = arith.constant 0 : i32
    return %c0_i32, %c0_i32_0 : i32, i32
  }
  func.func @transform_9(%arg0: i32) -> (i32, i32, i32) {
    %c0_i32 = arith.constant 0 : i32
    %c0_i32_0 = arith.constant 0 : i32
    %c0_i32_1 = arith.constant 0 : i32
    return %arg0, %c0_i32, %c0_i32_0 : i32, i32, i32
  }
}

</mosaic_0001>

<bundles_post_ra>
// kernel: tpu_custom_call.1
= control target key start
LH: loop header
LB: loop body
LE: loop exit
PB: predicated region body
PF: predicated region fallthrough
CT: control target
= control target key end

     0   :  { %s522_s0 = inlined_call_operand.vmem [shape: f32[8,103], index: 0, kind: input, shape index: {}]   ;;  %s523_s1 = inlined_call_operand.vmem [shape: f32[103,64], index: 1, kind: input, shape index: {}]   ;;  %s524_s2 = inlined_call_operand.vmem [shape: f32[1,64], index: 2, kind: input, shape index: {}]   ;;  %s525_s3 = inlined_call_operand.vmem [shape: f32[64,144], index: 3, kind: input, shape index: {}]   ;;  %s526_s4 = inlined_call_operand.vmem [shape: f32[1,144], index: 4, kind: input, shape index: {}]   ;;  %s527_s5 = inlined_call_operand.vmem [shape: f32[144,36], index: 5, kind: input, shape index: {}]   ;;  %s528_s6 = inlined_call_operand.vmem [shape: f32[1,36], index: 6, kind: input, shape index: {}]   ;;  %s529_s7 = inlined_call_operand.vmem [shape: f32[1,36], index: 7, kind: input, shape index: {}]   ;;  %s530_s8 = inlined_call_operand.<no memory space> [shape: f32[1,1], index: 8, kind: input, shape index: {}]   ;;  %s531_s9 = inlined_call_operand.hbm [shape: f32[1,1,8], index: 9, kind: output, shape index: {}]  }
   0x1   :  { %v14_v0 = vstv %s530_s8 }
   0x2   :  { %15 = vst [vmem:[#allocation2] sm:$0x1] %v14_v0 }
   0x3   :  { %v48_v1 = vld [vmem:[%s523_s1 + $0x60] sm:$0x7f]  ;;  %vm57_vm0 = vcmask 1046528   ;;  %v47_v2 = vld [vmem:[%s523_s1 + $0x58] sm:$0xff]  ;;  %v46_v3 = vld [vmem:[%s523_s1 + $0x50] sm:$0xff] }
   0x4   :  { %270 = vmatpush.msk.msra.mxu0 %vm57_vm0, %v48_v1  ;;  %v45_v4 = vld [vmem:[%s523_s1 + $0x48] sm:$0xff]  ;;  %v96_v5 = vld [vmem:[%s525_s3 + $0x70] sm:$0xff]  ;;  %v97_v6 = vld [vmem:[%s525_s3 + $0x78] sm:$0xff] }
   0x5   :  { %116 = vmatpush.msra.mxu1 %v96_v5  ;;  %v94_v7 = vld [vmem:[%s525_s3 + $0x60] sm:$0xff]  ;;  %v95_v8 = vld [vmem:[%s525_s3 + $0x68] sm:$0xff]  ;;  %136 = vmatpush.msra.mxu2 %v97_v6  ;;  %v92_v10 = vld [vmem:[%s525_s3 + $0x50] sm:$0xff] }
   0x6   :  { %65 = vmatpush.msra.mxu0 %v47_v2  ;;  %v44_v9 = vld [vmem:[%s523_s1 + $0x40] sm:$0xff]  ;;  %v43_v11 = vld [vmem:[%s523_s1 + $0x38] sm:$0xff]  ;;  %v91_v14 = vld [vmem:[%s525_s3 + $0x48] sm:$0xff] }
   0x7   :  { %117 = vmatpush.msra.mxu1 %v94_v7  ;;  %v93_v12 = vld [vmem:[%s525_s3 + $0x58] sm:$0xff]  ;;  %137 = vmatpush.msra.mxu2 %v95_v8  ;;  %v90_v13 = vld [vmem:[%s525_s3 + $0x40] sm:$0xff] }
   0x8   :  { %66 = vmatpush.msra.mxu0 %v46_v3 }
   0x9   :  { %118 = vmatpush.msra.mxu1 %v92_v10 }
   0xa   :  { %67 = vmatpush.msra.mxu0 %v45_v4 }
   0xc   :  { %68 = vmatpush.msra.mxu0 %v44_v9 }
   0xd   :  { %16 = vsyncpa [#allocation4], 0  ;;  %v42_v15 = vld [vmem:[%s523_s1 + $0x30] sm:$0xff]  ;;  %138 = vmatpush.msra.mxu2 %v93_v12  ;;  %119 = vmatpush.msra.mxu1 %v90_v13  ;;  %v89_v17 = vld [vmem:[%s525_s3 + $0x38] sm:$0xff]  ;;  %vm53_vm1 = vcmask 842752   ;;  %vm104_vm2 = vcmask 523264  }
   0xe   :  { %v88_v16 = vld [vmem:[%s525_s3 + $0x30] sm:$0xff]  ;;  %69 = vmatpush.msra.mxu0 %v43_v11  ;;  %v41_v18 = vld [vmem:[%s523_s1 + $0x28] sm:$0xff]  ;;  %v40_v19 = vld [vmem:[%s523_s1 + $0x20] sm:$0xff]  ;;  %vm172_vm3 = vcmask 130048   ;;  %v308_v63 = vmov 0   ;;  %vm225_vm4 = vcmask 293888  }
   0xf   :  { %139 = vmatpush.msra.mxu2 %v91_v14  ;;  %120 = vmatpush.msra.mxu1 %v88_v16  ;;  %v39_v20 = vld [vmem:[%s523_s1 + $0x18] sm:$0xff]  ;;  %v38_v21 = vld [vmem:[%s523_s1 + $0x10] sm:$0xff]  ;;  %v37_v22 = vld [vmem:[%s523_s1 + $0x8] sm:$0xff]  ;;  %s309_s18 = smov [#allocation3]   ;;  %vm252_vm5 = vcmask 57344  }
  0x10   :  { %70 = vmatpush.msra.mxu0 %v42_v15  ;;  %v36_v23 = vld [vmem:[%s523_s1] sm:$0xff]  ;;  %v87_v26 = vld [vmem:[%s525_s3 + $0x28] sm:$0xff]  ;;  %v84_v27 = vld [vmem:[%s525_s3 + $0x10] sm:$0xff]  ;;  %279 = vset.pattern.permute.xlu0 %v308_v63  ;;  %s259_s8 = sshll.u32 %s309_s18, 4  ;;  %s260_s8 = int_to_ptr.vmem [resolvable:$true] %s259_s8 }
  0x11   :  { %140 = vmatpush.msra.mxu2 %v89_v17  ;;  %v35_v24 = vld [vmem:[%s522_s0] sm:$0xff]  ;;  %v85_v28 = vld [vmem:[%s525_s3 + $0x18] sm:$0xff]  ;;  %v83_v30 = vld [vmem:[%s525_s3 + $0x8] sm:$0xff] }
  0x12   :  { %71 = vmatpush.msra.mxu0 %v41_v18  ;;  %v86_v25 = vld [vmem:[%s525_s3 + $0x20] sm:$0xff]  ;;  %v165_v31 = vld [vmem:[%s527_s5 + $0x78] sm:$0xff]  ;;  %v164_v32 = vld [vmem:[%s527_s5 + $0x70] sm:$0xff] }
  0x13   :  { %121 = vmatpush.msra.mxu1 %v86_v25  ;;  %141 = vmatpush.msra.mxu2 %v87_v26  ;;  %v82_v29 = vld [vmem:[%s525_s3] sm:$0xff]  ;;  %v163_v33 = vld [vmem:[%s527_s5 + $0x68] sm:$0xff]  ;;  %v161_v35 = vld [vmem:[%s527_s5 + $0x58] sm:$0xff] }
  0x14   :  { %72 = vmatpush.msra.mxu0 %v40_v19  ;;  %176 = vmatpush.msra.mxu3 %v165_v31  ;;  %v162_v34 = vld [vmem:[%s527_s5 + $0x60] sm:$0xff]  ;;  %v160_v36 = vld [vmem:[%s527_s5 + $0x50] sm:$0xff]  ;;  %v159_v37 = vld [vmem:[%s527_s5 + $0x48] sm:$0xff] }
  0x15   :  { %122 = vmatpush.msra.mxu1 %v84_v27  ;;  %142 = vmatpush.msra.mxu2 %v85_v28  ;;  %v158_v38 = vld [vmem:[%s527_s5 + $0x40] sm:$0xff]  ;;  %v157_v39 = vld [vmem:[%s527_s5 + $0x38] sm:$0xff]  ;;  %v156_v40 = vld [vmem:[%s527_s5 + $0x30] sm:$0xff] }
  0x16   :  { %73 = vmatpush.msra.mxu0 %v39_v20  ;;  %177 = vmatpush.msra.mxu3 %v164_v32  ;;  %v155_v41 = vld [vmem:[%s527_s5 + $0x28] sm:$0xff]  ;;  %v154_v42 = vld [vmem:[%s527_s5 + $0x20] sm:$0xff]  ;;  %v153_v43 = vld [vmem:[%s527_s5 + $0x18] sm:$0xff] }
  0x17   :  { %123 = vmatpush.msra.mxu1 %v82_v29  ;;  %143 = vmatpush.msra.mxu2 %v83_v30  ;;  %v280_v44 = vld [vmem:[%s524_s2] ss:$0 sm:$0xff]  ;;  %v152_v48 = vld [vmem:[%s527_s5 + $0x10] sm:$0xff]  ;;  %v151_v49 = vld [vmem:[%s527_s5 + $0x8] sm:$0xff] }
  0x18   :  { %74 = vmatpush.msra.mxu0 %v38_v21  ;;  %178 = vmatpush.msra.mxu3 %v163_v33  ;;  %v150_v50 = vld [vmem:[%s527_s5] sm:$0xff]  ;;  %v167_v51 = vld [vmem:[%s527_s5 + $0x88] sm:$0xff] }
  0x19   :  { %210 = vmatpush.msrb.mxu1 %v167_v51  ;;  %v166_v52 = vld [vmem:[%s527_s5 + $0x80] sm:$0xff] }
  0x1a   :  { %75 = vmatpush.msra.mxu0 %v37_v22  ;;  %179 = vmatpush.msra.mxu3 %v162_v34  ;;  %v98_v53 = vld [vmem:[%s526_s4] sm:$0x3] }
  0x1b   :  { %211 = vmatpush.msrb.mxu1 %v166_v52  ;;  %v100_v54 = vperm.slane %v98_v53, 0  ;;  %v101_v58 = vperm.slane %v98_v53, 1  ;;  %v218_v62 = vld [vmem:[#allocation2] sm:$0x1] }
  0x1c   :  { %76 = vmatpush.msra.mxu0 %v36_v23  ;;  %180 = vmatpush.msra.mxu3 %v161_v35  ;;  %v281_v0 = vld [vmem:[%s528_s6] ss:$0 sm:$0xff]  ;;  %s261_s6 = sshll.u32 %s531_s9, 4  ;;  %s262_s6 = int_to_ptr.hbm [resolvable:$true] %s261_s6 }
  0x1d   :  { %271 = vmatmul.msk.f32.vlgmr.msra.gmra.mxu0 %vm53_vm1, %v35_v24  ;;  %221 = vperm.xlu0 %279, %v218_v62   ;;  %v217_v6 = vld [vmem:[%s529_s7] sm:$0x1] }
  0x1e   :  { %181 = vmatpush.msra.mxu3 %v160_v36 }
  0x20   :  { %182 = vmatpush.msra.mxu3 %v159_v37 }
  0x22   :  { %183 = vmatpush.msra.mxu3 %v158_v38 }
  0x24   :  { %184 = vmatpush.msra.mxu3 %v157_v39 }
  0x26   :  { %185 = vmatpush.msra.mxu3 %v156_v40 }
  0x28   :  { %186 = vmatpush.msra.mxu3 %v155_v41 }
  0x2a   :  { %187 = vmatpush.msra.mxu3 %v154_v42 }
  0x2c   :  { %188 = vmatpush.msra.mxu3 %v153_v43 }
  0x2e   :  { %189 = vmatpush.msra.mxu3 %v152_v48 }
  0x30   :  { %190 = vmatpush.msra.mxu3 %v151_v49 }
  0x32   :  { %191 = vmatpush.msra.mxu3 %v150_v50 }
  0x8f   :  { %v222_v7 = vpop.permute.xlu0 %221 }
  0x90   :  { %v224_v8 = vperm.slane %v222_v7, 0 }
  0x9a   :  { %v78_v45 = vpop.f32.mrf.mxu0 }
  0x9b   :  { %v79_v46 = vadd.f32 %v280_v44, %v78_v45 }
  0x9d   :  { %v81_v47 = vmax.f32 %v79_v46, 0.0 }
  0x9f   :  { %272 = vmatmul.msk.f32.vlgmr.msra.gmra.mxu1 %vm104_vm2, %v81_v47  ;;  %273 = vmatmul.msk.f32.vlgmr.msra.gmra.mxu2 %vm104_vm2, %v81_v47 }
 0x11c   :  { %v125_v55 = vpop.f32.mrf.mxu1 }
 0x11d   :  { %v126_v56 = vadd.f32 %v125_v55, %v100_v54 }
 0x11f   :  { %v148_v57 = vmax.f32 %v126_v56, 0.0 }
 0x121   :  { %192 = vmatmul.f32.vlgmr.msra.gmra.mxu3 %v148_v57 }
 0x122   :  { %v145_v59 = vpop.f32.mrf.mxu2 }
 0x123   :  { %v146_v60 = vadd.f32 %v145_v59, %v101_v58 }
 0x125   :  { %v149_v61 = vmax.f32 %v146_v60, 0.0 }
 0x127   :  { %274 = vmatmul.msk.f32.vlgmr.msrb.gmra.mxu1 %vm172_vm3, %v149_v61 }
 0x1a4   :  { %v193_v1 = vpop.f32.mrf.mxu3  ;;  %v213_v3 = vpop.f32.mrf.mxu1 }
 0x1a5   :  { %v194_v2 = vadd.f32 %v281_v0, %v193_v1 }
 0x1a7   :  { %v214_v4 = vadd.f32 %v213_v3, %v194_v2 }
 0x1a9   :  { %v216_v5 = vmax.f32 %v214_v4, 0.0 }
 0x1ab   :  { %275 = vmatpush.xpose.msk.msrb.mxu2 %vm225_vm4, %v216_v5 }
 0x1ae   :  { %276 = vmatmul.msk.f32.vlgmr.msrb.gmra.mxu2 %vm225_vm4, %v217_v6 }
 0x231   :  { %v249_v9 = vpop.f32.mrf.mxu2 }
 0x232   :  { %v250_v10 = vadd.f32 %v249_v9, %v224_v8 }
 0x234   :  { %253 = vst.msk [vmem:[#allocation3] sm:$0x1] %vm252_vm5, %v250_v10 }
 0x235   :  { %264 = dma.vmem_to_hbm [thread:$0]  %s260_s8, 16, %s262_s6, [#allocation4]  }
 0x236   :  { %306 = dma.done.wait [#allocation4], 16  }
 0x237   :  { %307 = vsyncadd [#allocation4], 4294967280 }
 0x238   :  { %269 = vsyncpa [#allocation4], 1 }

</bundles_post_ra>
